<compile_context>
chip_gen: v6e
topology: v6e:2x2x1
jax: 0.10.0
libtpu: 0.0.40
codegen_flags: <defaults>
</compile_context>

<pallas_src>
import functools
from typing import NamedTuple, Optional

import jax
import jax.numpy as jnp
from jax.experimental import pallas as pl
from jax.experimental.pallas import tpu as pltpu


def _round_up(n, m):
    return ((n + m - 1) // m) * m


# --------------------------------------------------------------------------
# Kernels
# --------------------------------------------------------------------------
def _gru_gate_kernel_resident(x_ref, y_ref, wi_ref, wh_ref, bgi_ref, bhn_ref,
                              out_ref):
    """One (tm, H) row tile; weights fully resident in VMEM.

    wi_ref / wh_ref : (H, 3H) fused weights, column blocks [r | z | n].
    bgi_ref         : (1, 3H) = [b_ir + b_hr | b_iz + b_hz | b_in].
    bhn_ref         : (1, H)  = b_hn (kept separate: it is gated by r).
    """
    H = out_ref.shape[-1]
    w_dtype = wi_ref.dtype

    x = x_ref[...]
    # Two fused MXU matmuls with f32 accumulation.  Operands are cast to the
    # weight dtype so bf16 weights hit the bf16 MXU path on v6e/v7x.
    gi = jnp.dot(y_ref[...].astype(w_dtype), wi_ref[...],
                 preferred_element_type=jnp.float32) + bgi_ref[...]
    gh = jnp.dot(x.astype(w_dtype), wh_ref[...],
                 preferred_element_type=jnp.float32)

    # r and z share one (tm, 2H) sigmoid; keeps fewer f32 temporaries live.
    rz = jax.nn.sigmoid(gi[:, :2 * H] + gh[:, :2 * H])
    r = rz[:, :H]
    z = rz[:, H:]
    n = jnp.tanh(gi[:, 2 * H:] + r * (gh[:, 2 * H:] + bhn_ref[...]))

    out_ref[...] = ((1.0 - z) * n + z * x.astype(jnp.float32)).astype(out_ref.dtype)


def _gru_gate_kernel_ktiled(x_ref, xk_ref, yk_ref, wi_ref, wh_ref, bgi_ref,
                            bhn_ref, out_ref, rz_acc, gin_acc, ghn_acc):
    """Weight-streaming variant: grid = (row tiles, K tiles).

    x_ref   : (tm, H)  full-width hidden state (needed at finalize).
    xk_ref  : (tm, tk) K slice of x;  yk_ref : (tm, tk) K slice of y.
    wi_ref  : (tk, 3H) K slice of the fused input weights;  wh_ref likewise.
    Scratch : rz_acc (tm, 2H) f32, gin_acc (tm, H) f32, ghn_acc (tm, H) f32.
    """
    H = out_ref.shape[-1]
    k = pl.program_id(1)
    w_dtype = wi_ref.dtype

    @pl.when(k == 0)
    def _():
        rz_acc[...] = jnp.zeros_like(rz_acc)
        gin_acc[...] = jnp.zeros_like(gin_acc)
        ghn_acc[...] = jnp.zeros_like(ghn_acc)

    pgi = jnp.dot(yk_ref[...].astype(w_dtype), wi_ref[...],
                  preferred_element_type=jnp.float32)
    pgh = jnp.dot(xk_ref[...].astype(w_dtype), wh_ref[...],
                  preferred_element_type=jnp.float32)
    # r/z only ever need the SUM of the two matmuls -> one accumulator.
    rz_acc[...] += pgi[:, :2 * H] + pgh[:, :2 * H]
    gin_acc[...] += pgi[:, 2 * H:]
    ghn_acc[...] += pgh[:, 2 * H:]

    @pl.when(k == pl.num_programs(1) - 1)
    def _():
        rz = jax.nn.sigmoid(rz_acc[...] + bgi_ref[:, :2 * H])
        r = rz[:, :H]
        z = rz[:, H:]
        n = jnp.tanh(gin_acc[...] + bgi_ref[:, 2 * H:]
                     + r * (ghn_acc[...] + bhn_ref[...]))
        x_f32 = x_ref[...].astype(jnp.float32)
        out_ref[...] = ((1.0 - z) * n + z * x_f32).astype(out_ref.dtype)


# --------------------------------------------------------------------------
# Parameter prepack (one-time, outside the per-call path)
# --------------------------------------------------------------------------
class GruGateParams(NamedTuple):
    wi: jax.Array    # (H, 3H)  y-side weights, columns [r | z | n]
    wh: jax.Array    # (H, 3H)  x-side weights, columns [r | z | n]
    b_gi: jax.Array  # (1, 3H)  [b_ir+b_hr | b_iz+b_hz | b_in], f32
    b_hn: jax.Array  # (1, H)   b_hn (hidden-side n bias, gated by r), f32


def prepack_gru_params(w_ih, w_hh, b_ih, b_hh, weight_dtype=jnp.bfloat16):
    """Transpose / cast / bias-fuse the PyTorch GRUCell params ONCE."""
    H = w_ih.shape[1]
    wi = jnp.asarray(w_ih).T.astype(weight_dtype)
    wh = jnp.asarray(w_hh).T.astype(weight_dtype)
    b_ih32 = jnp.asarray(b_ih, jnp.float32)
    b_hh32 = jnp.asarray(b_hh, jnp.float32)
    b_gi = jnp.concatenate(
        [b_ih32[:2 * H] + b_hh32[:2 * H],   # r,z: input + hidden bias fused
         b_ih32[2 * H:]]).reshape(1, 3 * H)  # n: input-side bias only
    b_hn = b_hh32[2 * H:].reshape(1, H)
    return GruGateParams(wi=wi, wh=wh, b_gi=b_gi, b_hn=b_hn)


def init_gru_params(key, hidden, dtype=jnp.float32):
    """PyTorch-style GRUCell params: weight_ih (3H,H), weight_hh (3H,H),
    bias_ih (3H,), bias_hh (3H,), uniform(-1/sqrt(H), 1/sqrt(H))."""
    k = 1.0 / jnp.sqrt(jnp.asarray(hidden, jnp.float32))
    k1, k2, k3, k4 = jax.random.split(key, 4)
    w_ih = jax.random.uniform(k1, (3 * hidden, hidden), dtype, -k, k)
    w_hh = jax.random.uniform(k2, (3 * hidden, hidden), dtype, -k, k)
    b_ih = jax.random.uniform(k3, (3 * hidden,), dtype, -k, k)
    b_hh = jax.random.uniform(k4, (3 * hidden,), dtype, -k, k)
    return w_ih, w_hh, b_ih, b_hh


# --------------------------------------------------------------------------
# Per-generation tiling / VMEM configuration
# --------------------------------------------------------------------------
class _Config(NamedTuple):
    tm: int
    tk: int
    k_tiled: bool
    vmem_limit: int


@functools.lru_cache(maxsize=1)
def _vmem_capacity_bytes():
    try:
        info = pltpu.get_tpu_info()
        for attr in ("vmem_capacity_bytes", "vmem_size_bytes", "vmem_bytes"):
            cap = getattr(info, attr, None)
            if cap:
                return int(cap)
    except Exception:
        pass
    return 64 * 1024 * 1024  # conservative fallback = v7x per-TC VMEM


def _resident_bytes(tm, H, wbytes, act_bytes, out_bytes):
    weights = 2 * H * 3 * H * wbytes                 # single-buffered constants
    biases = 4 * H * 4
    io = 2 * tm * H * (2 * act_bytes + out_bytes)    # double-buffered x, y, out
    # kernel body: gi/gh (tm,3H) f32, rz (tm,2H), n + out_f32 (tm,H each),
    # plus the bf16 casts of x/y when weight dtype != activation dtype.
    body = tm * H * 4 * 10 + 2 * tm * H * wbytes
    return weights + biases + io + body


def _ktiled_bytes(tm, tk, H, wbytes, act_bytes, out_bytes):
    weights = 2 * 2 * tk * 3 * H * wbytes            # double-buffered K slices
    biases = 4 * H * 4
    io = 2 * tm * H * act_bytes                      # full-width x
    io += 2 * 2 * tm * tk * act_bytes                # x, y K slices
    io += 2 * tm * H * out_bytes                     # output
    acc = tm * 4 * H * 4                             # rz + gi_n + gh_n scratch
    body = 2 * tm * 3 * H * 4 + 2 * tm * tk * wbytes + 4 * tm * H * 4
    return weights + biases + io + acc + body


def _select_config(N, H, act_bytes, weight_dtype, tm=None, tk=None,
                   force_k_tiling=False):
    budget = int(0.80 * _vmem_capacity_bytes())      # ~102 MiB v5e/v6e, ~51 MiB v7x
    wbytes = jnp.dtype(weight_dtype).itemsize
    out_bytes = act_bytes
    n_rounded = _round_up(max(int(N), 1), 8)

    if tm is not None:
        tm_candidates = [min(_round_up(int(tm), 8), n_rounded)]
    else:
        tm_candidates = sorted({min(t, n_rounded) for t in (1024, 512, 256, 128)},
                               reverse=True)

    can_k_tile = (H % 128 == 0) and (H >= 256)
    k_tiled = bool(force_k_tiling and can_k_tile)
    if not k_tiled and can_k_tile:
        # Stream weights when even the smallest resident row tile overshoots.
        k_tiled = _resident_bytes(tm_candidates[-1], H, wbytes, act_bytes,
                                  out_bytes) > budget

    if not k_tiled:
        tm_sel = tm_candidates[-1]
        for t in tm_candidates:
            if _resident_bytes(t, H, wbytes, act_bytes, out_bytes) <= budget:
                tm_sel = t
                break
        return _Config(tm=tm_sel, tk=H, k_tiled=False, vmem_limit=budget)

    if tk is not None:
        assert H % int(tk) == 0, "tk must divide H"
        tk_candidates = [int(tk)]
    else:
        tk_candidates = [t for t in (512, 256, 128) if H % t == 0] or [H]

    tm_sel, tk_sel = tm_candidates[-1], tk_candidates[-1]
    for t_m in tm_candidates:
        found = False
        for t_k in tk_candidates:
            if _ktiled_bytes(t_m, t_k, H, wbytes, act_bytes, out_bytes) <= budget:
                tm_sel, tk_sel = t_m, t_k
                found = True
                break
        if found:
            break
    return _Config(tm=tm_sel, tk=tk_sel, k_tiled=True, vmem_limit=budget)


# --------------------------------------------------------------------------
# pallas_call wrappers
# --------------------------------------------------------------------------
@functools.partial(jax.jit, static_argnames=("cfg",))
def _gru_gate_call(x, y, params, cfg):
    batch, length, H = x.shape
    N = batch * length
    xf = x.reshape(N, H)
    yf = y.reshape(N, H)
    tm = cfg.tm
    const_mode = pl.Buffered(1)   # constant index_map -> block revisited, 1 buffer

    compiler_params = pltpu.CompilerParams(
        dimension_semantics=(("parallel", "arbitrary") if cfg.k_tiled
                             else ("parallel",)),
        vmem_limit_bytes=cfg.vmem_limit,
    )

    if not cfg.k_tiled:
        row_spec = pl.BlockSpec((tm, H), lambda i: (i, 0))
        wi_spec = pl.BlockSpec((H, 3 * H), lambda i: (0, 0), pipeline_mode=const_mode)
        wh_spec = pl.BlockSpec((H, 3 * H), lambda i: (0, 0), pipeline_mode=const_mode)
        bgi_spec = pl.BlockSpec((1, 3 * H), lambda i: (0, 0), pipeline_mode=const_mode)
        bhn_spec = pl.BlockSpec((1, H), lambda i: (0, 0), pipeline_mode=const_mode)
        out = pl.pallas_call(
            _gru_gate_kernel_resident,
            out_shape=jax.ShapeDtypeStruct((N, H), x.dtype),
            grid_spec=pltpu.PrefetchScalarGridSpec(
                num_scalar_prefetch=0,
                grid=(pl.cdiv(N, tm),),
                in_specs=[row_spec, row_spec, wi_spec, wh_spec, bgi_spec, bhn_spec],
                out_specs=row_spec,
            ),
            compiler_params=compiler_params,
        )(xf, yf, params.wi, params.wh, params.b_gi, params.b_hn)
    else:
        tk = cfg.tk
        x_spec = pl.BlockSpec((tm, H), lambda i, k: (i, 0))      # full width for finalize
        xk_spec = pl.BlockSpec((tm, tk), lambda i, k: (i, k))    # K slices for matmul
        w_spec = pl.BlockSpec((tk, 3 * H), lambda i, k: (k, 0))  # streamed weights
        bgi_spec = pl.BlockSpec((1, 3 * H), lambda i, k: (0, 0), pipeline_mode=const_mode)
        bhn_spec = pl.BlockSpec((1, H), lambda i, k: (0, 0), pipeline_mode=const_mode)
        out_spec = pl.BlockSpec((tm, H), lambda i, k: (i, 0))
        out = pl.pallas_call(
            _gru_gate_kernel_ktiled,
            out_shape=jax.ShapeDtypeStruct((N, H), x.dtype),
            grid_spec=pltpu.PrefetchScalarGridSpec(
                num_scalar_prefetch=0,
                grid=(pl.cdiv(N, tm), H // tk),
                in_specs=[x_spec, xk_spec, xk_spec, w_spec, w_spec,
                          bgi_spec, bhn_spec],
                out_specs=out_spec,
                scratch_shapes=[pltpu.VMEM((tm, 2 * H), jnp.float32),
                                pltpu.VMEM((tm, H), jnp.float32),
                                pltpu.VMEM((tm, H), jnp.float32)],
            ),
            compiler_params=compiler_params,
        )(xf, xf, yf, params.wi, params.wh, params.b_gi, params.b_hn)

    return out.reshape(batch, length, H)


def gru_gate_layer(x, y, params, *, tm=None, tk=None, force_k_tiling=False):
    """Pallas GruGateLayer.forward(x, y) == torch.nn.GRUCell(y, x).

    `params` comes from prepack_gru_params (one-time host-side prepack).
    Output dtype == x dtype (pass bf16 x/y for bf16 end-to-end I/O)."""
    batch, length, H = x.shape
    cfg = _select_config(batch * length, H, x.dtype.itemsize, params.wi.dtype,
                         tm=tm, tk=tk, force_k_tiling=force_k_tiling)
    return _gru_gate_call(x, y, params, cfg=cfg)


def gru_gate_layer_from_raw(x, y, w_ih, w_hh, b_ih, b_hh, *,
                            weight_dtype=jnp.bfloat16, **kw):
    """Convenience drop-in (prepacks per call; prefer prepack + gru_gate_layer)."""
    return gru_gate_layer(x, y,
                          prepack_gru_params(w_ih, w_hh, b_ih, b_hh, weight_dtype),
                          **kw)


# --------------------------------------------------------------------------
# Pure-JAX reference (torch.nn.GRUCell(y, x) semantics)
# --------------------------------------------------------------------------
def gru_gate_reference(x, y, w_ih, w_hh, b_ih, b_hh):
    batch, length, H = x.shape
    h = x.reshape(-1, H).astype(jnp.float32)
    inp = y.reshape(-1, H).astype(jnp.float32)
    gi = inp @ w_ih.T + b_ih
    gh = h @ w_hh.T + b_hh
    i_r, i_z, i_n = gi[:, :H], gi[:, H:2 * H], gi[:, 2 * H:]
    h_r, h_z, h_n = gh[:, :H], gh[:, H:2 * H], gh[:, 2 * H:]
    r = jax.nn.sigmoid(i_r + h_r)
    z = jax.nn.sigmoid(i_z + h_z)
    n = jnp.tanh(i_n + r * h_n)
    out = (1.0 - z) * n + z * h
    return out.reshape(batch, length, H)


if __name__ == "__main__":
    key = jax.random.PRNGKey(0)

    # ---- 1) Small spec-sized test (resident-weight path) --------------------
    batch, length, hidden = 2, 8, 32
    kx, ky, kp, k2 = jax.random.split(key, 4)
    x = jax.random.normal(kx, (batch, length, hidden), jnp.float32)
    y = jax.random.normal(ky, (batch, length, hidden), jnp.float32)
    w_ih, w_hh, b_ih, b_hh = init_gru_params(kp, hidden)
    ref = gru_gate_reference(x, y, w_ih, w_hh, b_ih, b_hh)

    # Exact-precision path (f32 weights).
    p_f32 = prepack_gru_params(w_ih, w_hh, b_ih, b_hh, weight_dtype=jnp.float32)
    out_f32 = jax.block_until_ready(gru_gate_layer(x, y, p_f32))
    assert out_f32.shape == (batch, length, hidden)
    assert jnp.allclose(out_f32, ref, atol=1e-5, rtol=1e-5), "f32 mismatch"

    # Production path (bf16 weights / MXU operands, f32 gate math).
    p_bf16 = prepack_gru_params(w_ih, w_hh, b_ih, b_hh, weight_dtype=jnp.bfloat16)
    out_bf16 = jax.block_until_ready(gru_gate_layer(x, y, p_bf16))
    assert jnp.allclose(out_bf16, ref, atol=5e-2, rtol=5e-2), "bf16 mismatch"

    # bf16 activation I/O end-to-end (no extra cast pass inside the kernel path).
    out_bact = jax.block_until_ready(
        gru_gate_layer(x.astype(jnp.bfloat16), y.astype(jnp.bfloat16), p_f32))
    assert out_bact.dtype == jnp.bfloat16
    assert jnp.allclose(out_bact.astype(jnp.float32), ref, atol=5e-2, rtol=5e-2), \
        "bf16-activation mismatch"

    # ---- 2) Weight-streaming (K-tiled) path, forced at small scale ----------
    hidden2 = 256
    kx2, ky2, kp2 = jax.random.split(k2, 3)
    x2 = jax.random.normal(kx2, (batch, length, hidden2), jnp.float32)
    y2 = jax.random.normal(ky2, (batch, length, hidden2), jnp.float32)
    w_ih2, w_hh2, b_ih2, b_hh2 = init_gru_params(kp2, hidden2)
    ref2 = gru_gate_reference(x2, y2, w_ih2, w_hh2, b_ih2, b_hh2)

    p2_f32 = prepack_gru_params(w_ih2, w_hh2, b_ih2, b_hh2, weight_dtype=jnp.float32)
    out2 = jax.block_until_ready(
        gru_gate_layer(x2, y2, p2_f32, force_k_tiling=True, tk=128))  # nk = 2
    assert out2.shape == (batch, length, hidden2)
    assert jnp.allclose(out2, ref2, atol=1e-4, rtol=1e-4), "k-tiled f32 mismatch"

    p2_bf16 = prepack_gru_params(w_ih2, w_hh2, b_ih2, b_hh2, weight_dtype=jnp.bfloat16)
    out2b = jax.block_until_ready(
        gru_gate_layer(x2, y2, p2_bf16, force_k_tiling=True, tk=128))
    assert jnp.allclose(out2b, ref2, atol=5e-2, rtol=5e-2), "k-tiled bf16 mismatch"

    print("KERNEL_OK")
</pallas_src>

<mosaic_0001>
module attributes {stable_mosaic.version = 11 : i64} {
  func.func @_gru_gate_kernel_resident(%arg0: i32, %arg1: memref<16x32xf32, #tpu.memory_space<vmem>>, %arg2: memref<16x32xf32, #tpu.memory_space<vmem>>, %arg3: memref<32x96xf32, #tpu.memory_space<vmem>>, %arg4: memref<32x96xf32, #tpu.memory_space<vmem>>, %arg5: memref<1x96xf32, #tpu.memory_space<vmem>>, %arg6: memref<1x32xf32, #tpu.memory_space<vmem>>, %arg7: memref<16x32xf32, #tpu.memory_space<vmem>>) attributes {dimension_semantics = [#tpu.dimension_semantics<parallel>], iteration_bounds = array<i64: 1>, scalar_prefetch = 0 : i64, scratch_operands = 0 : i64, tpu.core_type = #tpu.core_type<tc>, window_params = [{transform_indices = @transform_0, window_bounds = array<i64: 16, 32>}, {transform_indices = @transform_1, window_bounds = array<i64: 16, 32>}, {pipeline_mode = #tpu.pipeline_mode<synchronous>, transform_indices = @transform_2, window_bounds = array<i64: 32, 96>}, {pipeline_mode = #tpu.pipeline_mode<synchronous>, transform_indices = @transform_3, window_bounds = array<i64: 32, 96>}, {pipeline_mode = #tpu.pipeline_mode<synchronous>, transform_indices = @transform_4, window_bounds = array<i64: 1, 96>}, {pipeline_mode = #tpu.pipeline_mode<synchronous>, transform_indices = @transform_5, window_bounds = array<i64: 1, 32>}, {transform_indices = @transform_6, window_bounds = array<i64: 16, 32>}]} {
    %c0 = arith.constant 0 : index
    %c0_0 = arith.constant 0 : index
    %0 = vector.load %arg1[%c0, %c0_0] : memref<16x32xf32, #tpu.memory_space<vmem>>, vector<16x32xf32>
    %c0_1 = arith.constant 0 : index
    %c0_2 = arith.constant 0 : index
    %1 = vector.load %arg2[%c0_1, %c0_2] : memref<16x32xf32, #tpu.memory_space<vmem>>, vector<16x32xf32>
    %c0_3 = arith.constant 0 : index
    %c0_4 = arith.constant 0 : index
    %2 = vector.load %arg3[%c0_3, %c0_4] : memref<32x96xf32, #tpu.memory_space<vmem>>, vector<32x96xf32>
    %cst = arith.constant dense<0.000000e+00> : vector<16x96xf32>
    %3 = tpu.matmul %1, %2, %cst {dimension_numbers = #tpu.dot_dimension_numbers<[1], [0], [0], [1], [0, 0, 1, 1], [], []>} : vector<16x32xf32>, vector<32x96xf32>, vector<16x96xf32> -> vector<16x96xf32>
    %c0_5 = arith.constant 0 : index
    %c0_6 = arith.constant 0 : index
    %4 = vector.load %arg5[%c0_5, %c0_6] : memref<1x96xf32, #tpu.memory_space<vmem>>, vector<1x96xf32>
    %5 = vector.broadcast %4 : vector<1x96xf32> to vector<16x96xf32>
    %6 = arith.addf %3, %5 : vector<16x96xf32>
    %c0_7 = arith.constant 0 : index
    %c0_8 = arith.constant 0 : index
    %7 = vector.load %arg4[%c0_7, %c0_8] : memref<32x96xf32, #tpu.memory_space<vmem>>, vector<32x96xf32>
    %cst_9 = arith.constant dense<0.000000e+00> : vector<16x96xf32>
    %8 = tpu.matmul %0, %7, %cst_9 {dimension_numbers = #tpu.dot_dimension_numbers<[1], [0], [0], [1], [0, 0, 1, 1], [], []>} : vector<16x32xf32>, vector<32x96xf32>, vector<16x96xf32> -> vector<16x96xf32>
    %9 = vector.extract_strided_slice %6 {offsets = [0, 0], sizes = [16, 64], strides = [1, 1]} : vector<16x96xf32> to vector<16x64xf32>
    %10 = vector.extract_strided_slice %8 {offsets = [0, 0], sizes = [16, 64], strides = [1, 1]} : vector<16x96xf32> to vector<16x64xf32>
    %11 = arith.addf %9, %10 : vector<16x64xf32>
    %12 = arith.negf %11 : vector<16x64xf32>
    %13 = math.exp %12 : vector<16x64xf32>
    %cst_10 = arith.constant 1.000000e+00 : f32
    %14 = vector.broadcast %cst_10 : f32 to vector<16x64xf32>
    %15 = arith.addf %14, %13 : vector<16x64xf32>
    %16 = arith.divf %14, %15 : vector<16x64xf32>
    %17 = vector.extract_strided_slice %16 {offsets = [0, 0], sizes = [16, 32], strides = [1, 1]} : vector<16x64xf32> to vector<16x32xf32>
    %18 = vector.extract_strided_slice %16 {offsets = [0, 32], sizes = [16, 32], strides = [1, 1]} : vector<16x64xf32> to vector<16x32xf32>
    %19 = vector.extract_strided_slice %6 {offsets = [0, 64], sizes = [16, 32], strides = [1, 1]} : vector<16x96xf32> to vector<16x32xf32>
    %20 = vector.extract_strided_slice %8 {offsets = [0, 64], sizes = [16, 32], strides = [1, 1]} : vector<16x96xf32> to vector<16x32xf32>
    %c0_11 = arith.constant 0 : index
    %c0_12 = arith.constant 0 : index
    %21 = vector.load %arg6[%c0_11, %c0_12] : memref<1x32xf32, #tpu.memory_space<vmem>>, vector<1x32xf32>
    %22 = vector.broadcast %21 : vector<1x32xf32> to vector<16x32xf32>
    %23 = arith.addf %20, %22 : vector<16x32xf32>
    %24 = arith.mulf %17, %23 : vector<16x32xf32>
    %25 = arith.addf %19, %24 : vector<16x32xf32>
    %26 = math.tanh %25 : vector<16x32xf32>
    %cst_13 = arith.constant 1.000000e+00 : f32
    %27 = vector.broadcast %cst_13 : f32 to vector<16x32xf32>
    %28 = arith.subf %27, %18 : vector<16x32xf32>
    %29 = arith.mulf %28, %26 : vector<16x32xf32>
    %30 = arith.mulf %18, %0 : vector<16x32xf32>
    %31 = arith.addf %29, %30 : vector<16x32xf32>
    %c0_14 = arith.constant 0 : index
    %c0_15 = arith.constant 0 : index
    %32 = vector.load %arg7[%c0_14, %c0_15] : memref<16x32xf32, #tpu.memory_space<vmem>>, vector<16x32xf32>
    tpu.vector_store %arg7[%c0_14, %c0_15], %31 {strides = array<i32>} : memref<16x32xf32, #tpu.memory_space<vmem>>, vector<16x32xf32>,
    return
  }
  func.func @transform_0(%arg0: i32) -> (i32, i32) {
    %c0_i32 = arith.constant 0 : i32
    %c0_i32_0 = arith.constant 0 : i32
    return %arg0, %c0_i32 : i32, i32
  }
  func.func @transform_1(%arg0: i32) -> (i32, i32) {
    %c0_i32 = arith.constant 0 : i32
    %c0_i32_0 = arith.constant 0 : i32
    return %arg0, %c0_i32 : i32, i32
  }
  func.func @transform_2(%arg0: i32) -> (i32, i32) {
    %c0_i32 = arith.constant 0 : i32
    %c0_i32_0 = arith.constant 0 : i32
    %c0_i32_1 = arith.constant 0 : i32
    return %c0_i32, %c0_i32_0 : i32, i32
  }
  func.func @transform_3(%arg0: i32) -> (i32, i32) {
    %c0_i32 = arith.constant 0 : i32
    %c0_i32_0 = arith.constant 0 : i32
    %c0_i32_1 = arith.constant 0 : i32
    return %c0_i32, %c0_i32_0 : i32, i32
  }
  func.func @transform_4(%arg0: i32) -> (i32, i32) {
    %c0_i32 = arith.constant 0 : i32
    %c0_i32_0 = arith.constant 0 : i32
    %c0_i32_1 = arith.constant 0 : i32
    return %c0_i32, %c0_i32_0 : i32, i32
  }
  func.func @transform_5(%arg0: i32) -> (i32, i32) {
    %c0_i32 = arith.constant 0 : i32
    %c0_i32_0 = arith.constant 0 : i32
    %c0_i32_1 = arith.constant 0 : i32
    return %c0_i32, %c0_i32_0 : i32, i32
  }
  func.func @transform_6(%arg0: i32) -> (i32, i32) {
    %c0_i32 = arith.constant 0 : i32
    %c0_i32_0 = arith.constant 0 : i32
    return %arg0, %c0_i32 : i32, i32
  }
}

</mosaic_0001>

<bundles_post_ra>
// kernel: _gru_gate_call.1
= control target key start
LH: loop header
LB: loop body
LE: loop exit
PB: predicated region body
PF: predicated region fallthrough
CT: control target
= control target key end

     0   :  { %11 = vsyncpa [#allocation3], 0  ;;  %s623_s0 = inlined_call_operand.hbm [shape: f32[16,32], index: 0, kind: input, shape index: {}]   ;;  %s624_s1 = inlined_call_operand.hbm [shape: f32[16,32], index: 1, kind: input, shape index: {}]   ;;  %s625_s2 = inlined_call_operand.hbm [shape: f32[32,96], index: 2, kind: input, shape index: {}]   ;;  %s626_s3 = inlined_call_operand.hbm [shape: f32[32,96], index: 3, kind: input, shape index: {}]   ;;  %s627_s4 = inlined_call_operand.vmem [shape: f32[1,96], index: 4, kind: input, shape index: {}]   ;;  %s628_s5 = inlined_call_operand.vmem [shape: f32[1,32], index: 5, kind: input, shape index: {}]   ;;  %s629_s6 = inlined_call_operand.hbm [shape: f32[16,32], index: 6, kind: output, shape index: {}]  }
   0x1   :  { %12 = vsyncpa [#allocation6], 0 }
   0x2   :  { %13 = vsyncpa [#allocation9], 0 }
   0x3   :  { %14 = vsyncpa [#allocation4], 0  ;;  %s531_s21 = smov [#allocation5]   ;;  %s532_s23 = smov [#allocation2]  }
   0x4   :  { %s32_s22 = sshll.u32 %s531_s21, 4  ;;  %s20_s24 = sshll.u32 %s532_s23, 4  ;;  %s33_s22 = int_to_ptr.vmem [resolvable:$true] %s32_s22  ;;  %s21_s24 = int_to_ptr.vmem [resolvable:$true] %s20_s24 }
   0x5   :  { %s431_s25 = scalar_lea.vmem %s33_s22, 256  ;;  %p436_p1 = scmp.lt.s32.totalorder %s33_s22, %s33_s22 }
   0x6   :  { %p432_p0 = scmp.ne.s32.totalorder %s33_s22, %s431_s25  ;;  %p437_p2 = scmp.lt.s32.totalorder %s431_s25, %s431_s25 }
   0x8   :  { %p438_p3 = por %p437_p2, %p436_p1 }
   0xa   :  { %p439_p4 = pnand %p438_p3, %p432_p0 }
   0xc   :  { %442 = shalt.err (!%p439_p4)
}
   0xd   :  { %s533_s26 = smov 128   ;;  %s534_s27 = smov 8  }
   0xe   :  { %38 = dma.hbm_to_vmem [thread:$0]  %s624_s1, 256, %s33_s22, [#allocation6], %s533_s26, %s533_s26, %s534_s27  }
   0xf   :  { %s451_s30 = scalar_lea.vmem %s21_s24, 256  ;;  %p456_p6 = scmp.lt.s32.totalorder %s21_s24, %s21_s24 }
  0x10   :  { %p452_p5 = scmp.ne.s32.totalorder %s21_s24, %s451_s30  ;;  %p457_p7 = scmp.lt.s32.totalorder %s451_s30, %s451_s30 }
  0x12   :  { %p458_p8 = por %p457_p7, %p456_p6 }
  0x14   :  { %p459_p9 = pnand %p458_p8, %p452_p5 }
  0x16   :  { %462 = shalt.err (!%p459_p9)
}
  0x17   :  { %26 = dma.hbm_to_vmem [thread:$0]  %s623_s0, 256, %s21_s24, [#allocation3], %s533_s26, %s533_s26, %s534_s27  }
  0x18   :  { %s535_s9 = smov [#allocation7]   ;;  %s536_s11 = smov [#allocation8]  }
  0x19   :  { %s44_s10 = sshll.u32 %s535_s9, 4  ;;  %s56_s12 = sshll.u32 %s536_s11, 4  ;;  %s45_s10 = int_to_ptr.vmem [resolvable:$true] %s44_s10  ;;  %s57_s12 = int_to_ptr.vmem [resolvable:$true] %s56_s12 }
  0x1a   :  { %s471_s1 = scalar_lea.vmem %s45_s10, 512  ;;  %p476_p11 = scmp.lt.s32.totalorder %s45_s10, %s45_s10 }
  0x1b   :  { %p472_p10 = scmp.ne.s32.totalorder %s45_s10, %s471_s1  ;;  %p477_p12 = scmp.lt.s32.totalorder %s471_s1, %s471_s1 }
  0x1d   :  { %p478_p13 = por %p477_p12, %p476_p11 }
  0x1f   :  { %p479_p0 = pnand %p478_p13, %p472_p10 }
  0x21   :  { %482 = shalt.err (!%p479_p0)
}
  0x22   :  { %50 = dma.hbm_to_vmem [thread:$0]  %s625_s2, 512, %s45_s10, [#allocation6], %s533_s26, %s533_s26, %s534_s27  }
  0x23   :  { %s491_s0 = scalar_lea.vmem %s57_s12, 512  ;;  %p496_p2 = scmp.lt.s32.totalorder %s57_s12, %s57_s12 }
  0x24   :  { %p492_p1 = scmp.ne.s32.totalorder %s57_s12, %s491_s0  ;;  %p497_p3 = scmp.lt.s32.totalorder %s491_s0, %s491_s0 }
  0x26   :  { %p498_p4 = por %p497_p3, %p496_p2 }
  0x28   :  { %p499_p5 = pnand %p498_p4, %p492_p1 }
  0x2a   :  { %502 = shalt.err (!%p499_p5)
}
  0x2b   :  { %62 = dma.hbm_to_vmem [thread:$0]  %s626_s3, 512, %s57_s12, [#allocation9], %s533_s26, %s533_s26, %s534_s27  }
  0x2c   :  { %523 = dma.done.wait [#allocation3], 256  }
  0x2d   :  { %524 = vsyncadd [#allocation3], 4294967040 }
  0x2e   :  { %525 = dma.done.wait [#allocation6], 768  }
  0x2f   :  { %526 = vsyncadd [#allocation6], 4294966528 }
  0x30   :  { %527 = dma.done.wait [#allocation9], 512  }
  0x31   :  { %528 = vsyncadd [#allocation9], 4294966784  ;;  %v86_v0 = vld [vmem:[#allocation7 + $0x18] sm:$0xff]  ;;  %v85_v2 = vld [vmem:[#allocation7 + $0x10] sm:$0xff]  ;;  %vm94_vm0 = vcmask 261120   ;;  %s537_s17 = smov 64  }
  0x32   :  { %v179_v1 = vld [vmem:[#allocation8 + $0x18] sm:$0xff]  ;;  %379 = vmatprep.subr.mxu0 %v86_v0  ;;  %v178_v3 = vld [vmem:[#allocation8 + $0x10] sm:$0xff]  ;;  %v84_v4 = vld [vmem:[#allocation7 + $0x8] sm:$0xff]  ;;  %s539_s19 = smov 32   ;;  %s540_s20 = smov [#allocation10]  }
  0x33   :  { %390 = vmatprep.subr.mxu1 %v179_v1  ;;  %380 = vmatpush3.msra.mxu0 %v86_v0  ;;  %v177_v5 = vld [vmem:[#allocation8 + $0x8] sm:$0xff]  ;;  %v83_v6 = vld [vmem:[#allocation7] sm:$0xff]  ;;  %v81_v8 = vld [vmem:[#allocation5] sm:$0xff]  ;;  %s345_s21 = sshll.u32 %s540_s20, 4  ;;  %s346_s21 = int_to_ptr.vmem [resolvable:$true] %s345_s21 }
  0x34   :  { %391 = vmatpush3.msra.mxu1 %v179_v1  ;;  %381 = vmatprep.subr.mxu0 %v85_v2  ;;  %v176_v7 = vld [vmem:[#allocation8] sm:$0xff]  ;;  %v82_v10 = vld [vmem:[#allocation5 + $0x8] sm:$0xff]  ;;  %v80_v11 = vld [vmem:[#allocation2 + $0x8] sm:$0xff]  ;;  %s503_s22 = scalar_lea.vmem %s346_s21, 256  ;;  %p508_p7 = scmp.lt.s32.totalorder %s346_s21, %s346_s21 }
  0x35   :  { %392 = vmatprep.subr.mxu1 %v178_v3  ;;  %382 = vmatpush3.msra.mxu0 %v85_v2  ;;  %v79_v9 = vld [vmem:[#allocation2] sm:$0xff]  ;;  %p504_p6 = scmp.ne.s32.totalorder %s346_s21, %s503_s22  ;;  %p509_p8 = scmp.lt.s32.totalorder %s503_s22, %s503_s22 }
  0x36   :  { %393 = vmatpush3.msra.mxu1 %v178_v3  ;;  %383 = vmatprep.subr.mxu0 %v84_v4  ;;  %v366_v12 = vld [vmem:[%s628_s5] ss:$0 sm:$0xff] }
  0x37   :  { %394 = vmatprep.subr.mxu1 %v177_v5  ;;  %384 = vmatpush3.msra.mxu0 %v84_v4  ;;  %v359_v19 = vld [vmem:[%s627_s4] ss:$0 sm:$0xff]  ;;  %s538_s4 = smov 96   ;;  %p510_p9 = por %p509_p8, %p508_p7 }
  0x38   :  { %395 = vmatpush3.msra.mxu1 %v177_v5  ;;  %385 = vmatprep.subr.mxu0 %v83_v6 }
  0x39   :  { %396 = vmatprep.subr.mxu1 %v176_v7  ;;  %386 = vmatpush3.msra.mxu0 %v83_v6  ;;  %p511_p10 = pnand %p510_p9, %p504_p6 }
  0x3a   :  { %387 = vmatprep.mubr.msk.f32.mxu0 %vm94_vm0, %v81_v8  ;;  %397 = vmatpush3.msra.mxu1 %v176_v7 }
  0x3b   :  { %398 = vmatprep.mubr.msk.f32.mxu1 %vm94_vm0, %v79_v9  ;;  %388 = vmatmul.mubr.msk.f32.vlgmr.msra.gmra.mxu0 %vm94_vm0, %v82_v10 }
  0x3c   :  { %399 = vmatmul.mubr.msk.f32.vlgmr.msra.gmra.mxu1 %vm94_vm0, %v80_v11  ;;  %281 = vrot.lane.b32.xlu0 %v366_v12, %s537_s17 }
  0xae   :  { %v282_v13 = vpop.permute.xlu0 %281 }
  0xfb   :  { %v389_v18 = vpop.f32.mrf.mxu0 }
  0xfc   :  { %v400_v14 = vpop.f32.mrf.mxu1  ;;  %v173_v21 = vadd.f32 %v389_v18, %v359_v19 }
  0xfd   :  { %v285_v15 = vadd.f32 %v400_v14, %v282_v13  ;;  %v167_v20 = vpop.f32.mrf.mxu0 }
  0xfe   :  { %v252_v16 = vpop.f32.mrf.mxu1  ;;  %v168_v22 = vadd.f32 %v359_v19, %v167_v20  ;;  %v262_v23 = vadd.f32 %v400_v14, %v173_v21 }
  0xff   :  { %v284_v17 = vadd.f32 %v282_v13, %v252_v16  ;;  %290 = vrot.lane.b32.xlu1 %v285_v15, %s537_s17 }
 0x100   :  { %v261_v24 = vadd.f32 %v252_v16, %v168_v22  ;;  %v365_v25 = vmul.f32 -1.442695, %v262_v23 }
 0x101   :  { %288 = vrot.lane.b32.xlu0 %v284_v17, %s537_s17 }
 0x102   :  { %v364_v26 = vmul.f32 -1.442695, %v261_v24  ;;  %411 = vpow2.f32 %v365_v25 }
 0x104   :  { %413 = vpow2.f32 %v364_v26 }
 0x10f   :  { %v412_v27 = vpop.eup %411 }
 0x110   :  { %v270_v29 = vadd.f32 1.0, %v412_v27 }
 0x111   :  { %v414_v28 = vpop.eup %413 }
 0x112   :  { %v269_v30 = vadd.f32 1.0, %v414_v28  ;;  %415 = vrcp.f32 %v270_v29 }
 0x114   :  { %417 = vrcp.f32 %v269_v30 }
 0x11f   :  { %v416_v31 = vpop.eup %415 }
 0x120   :  { %v309_v45 = vsub.f32 1.0, %v416_v31 }
 0x121   :  { %v418_v34 = vpop.eup %417 }
 0x122   :  { %v308_v48 = vsub.f32 1.0, %v418_v34 }
 0x171   :  { %v291_v32 = vpop.permute.xlu1 %290 }
 0x172   :  { %v295_v33 = vmul.f32 %v416_v31, %v291_v32 }
 0x173   :  { %v289_v35 = vpop.permute.xlu0 %288 }
 0x174   :  { %v294_v36 = vmul.f32 %v418_v34, %v289_v35  ;;  %300 = vrot.lane.b32.xlu0 %v295_v33, %s537_s17 }
 0x176   :  { %298 = vrot.lane.b32.xlu1 %v294_v36, %s537_s17 }
 0x1e6   :  { %v301_v37 = vpop.permute.xlu0 %300 }
 0x1e7   :  { %v305_v38 = vadd.f32 %v301_v37, %v173_v21 }
 0x1e8   :  { %v299_v39 = vpop.permute.xlu1 %298 }
 0x1e9   :  { %419 = vtanh.f32 %v305_v38  ;;  %v304_v40 = vadd.f32 %v299_v39, %v168_v22 }
 0x1eb   :  { %421 = vtanh.f32 %v304_v40 }
 0x1f6   :  { %v420_v41 = vpop.eup %419 }
 0x1f7   :  { %314 = vrot.lane.b32.xlu0 %v420_v41, %s538_s4 }
 0x1f8   :  { %v422_v42 = vpop.eup %421 }
 0x1f9   :  { %312 = vrot.lane.b32.xlu1 %v422_v42, %s538_s4 }
 0x1fb   :  { %322 = vrot.lane.b32.xlu0 %v80_v11, %s539_s19 }
 0x1fd   :  { %320 = vrot.lane.b32.xlu1 %v79_v9, %s539_s19 }
 0x269   :  { %v315_v43 = vpop.permute.xlu0 %314 }
 0x26a   :  { %v319_v47 = vmul.f32 %v315_v43, %v309_v45 }
 0x26b   :  { %v313_v44 = vpop.permute.xlu1 %312 }
 0x26c   :  { %v318_v51 = vmul.f32 %v313_v44, %v308_v48 }
 0x26d   :  { %v323_v46 = vpop.permute.xlu0 %322 }
 0x26e   :  { %v327_v49 = vmul.f32 %v416_v31, %v323_v46 }
 0x26f   :  { %v321_v50 = vpop.permute.xlu1 %320 }
 0x270   :  { %v329_v52 = vadd.f32 %v327_v49, %v319_v47  ;;  %v326_v53 = vmul.f32 %v418_v34, %v321_v50 }
 0x272   :  { %v328_v54 = vadd.f32 %v326_v53, %v318_v51  ;;  %334 = vrot.lane.b32.xlu0 %v329_v52, %s538_s4 }
 0x274   :  { %332 = vrot.lane.b32.xlu1 %v328_v54, %s538_s4 }
 0x2e4   :  { %v335_v55 = vpop.permute.xlu0 %334 }
 0x2e5   :  { %339 = vst.msk [vmem:[#allocation10 + $0x8] sm:$0xff] %vm94_vm0, %v335_v55 }
 0x2e6   :  { %v333_v56 = vpop.permute.xlu1 %332 }
 0x2e7   :  { %338 = vst.msk [vmem:[#allocation10] sm:$0xff] %vm94_vm0, %v333_v56 }
 0x2e8   :  { %514 = shalt.err (!%p511_p10)
}
 0x2e9   :  { %351 = dma.vmem_to_hbm [thread:$0]  %s346_s21, 256, %s629_s6, [#allocation4], %s533_s26, %s533_s26, %s534_s27  }
 0x2ea   :  { %529 = dma.done.wait [#allocation4], 256  }
 0x2eb   :  { %530 = vsyncadd [#allocation4], 4294967040 }
 0x2ec   :  { %355 = vsyncpa [#allocation3], 1 }
 0x2ed   :  { %356 = vsyncpa [#allocation6], 1 }
 0x2ee   :  { %357 = vsyncpa [#allocation9], 1 }
 0x2ef   :  { %358 = vsyncpa [#allocation4], 1 }

</bundles_post_ra>
